<compile_context>
chip_gen: v6e
topology: v6e:2x2x1
jax: 0.10.0
libtpu: 0.0.40
codegen_flags: <defaults>
</compile_context>

<pallas_src>
import jax
import jax.numpy as jnp
from jax import lax
from jax.experimental import pallas as pl
from jax.experimental.pallas import tpu as pltpu


def _mimo_attn_kernel(qu_ref, wt_ref, b_ref, k_ref, v_ref, out_ref, attn_ref,
                      p_ref):
    """Grid = (batch_block, d_tile).  d_tile is the inner ("arbitrary") axis."""
    d_idx = pl.program_id(1)

    # Query projection + scores + softmax only on the first D tile; the
    # resulting probabilities are cached in VMEM scratch for the other tiles.
    @pl.when(d_idx == 0)
    def _():
        qu = qu_ref[...].astype(jnp.float32)      # (BB, Q, QS)
        wt = wt_ref[...]                          # (QS, KS) f32
        bias = b_ref[...]                         # (1, KS)  f32

        # query[b, q, o] = sum_i qu[b, q, i] * wt[i, o] + bias[o]
        query = lax.dot_general(
            qu, wt,
            dimension_numbers=(((2,), (0,)), ((), ())),
            preferred_element_type=jnp.float32,
        ) + bias                                   # (BB, Q, KS)

        kk = k_ref[...].astype(jnp.float32)        # (BB, K, KS)
        # scores[b, k, q] = sum_i kk[b, k, i] * query[b, q, i]
        scores = lax.dot_general(
            kk, query,
            dimension_numbers=(((2,), (2,)), ((0,), (0,))),
            preferred_element_type=jnp.float32,
        )                                          # (BB, K, Q)

        # Softmax over the KEY axis (PyTorch dim=1).
        m = jnp.max(scores, axis=1, keepdims=True)
        e = jnp.exp(scores - m)
        s = jnp.sum(e, axis=1, keepdims=True)
        p = e / s                                  # (BB, K, Q) f32
        p_ref[...] = p
        attn_ref[...] = p.astype(attn_ref.dtype)

    # Streamed weighted sum over keys for this D tile:
    #   out[b, q, d] = sum_k p[b, k, q] * v[b, k, d]
    v = v_ref[...]                                 # (BB, K, TD), native dtype
    p = p_ref[...].astype(v.dtype)                 # match v dtype for the MXU
    out = lax.dot_general(
        p, v,
        dimension_numbers=(((1,), (1,)), ((0,), (0,))),
        preferred_element_type=jnp.float32,
    )                                              # (BB, Q, TD) f32 accum
    out_ref[...] = out.astype(out_ref.dtype)


def _pick_td(D, cap=4096):
    """Largest lane-dense (multiple-of-128) divisor of D up to `cap`,
    or the full D if D is small / has no such divisor (full dims are legal)."""
    if D <= cap:
        return D
    best = D
    t = 128
    while t <= cap:
        if D % t == 0:
            best = t
        t += 128
    return best


def _pick_bb(B, Q, K, TD, n_d, elem_bytes):
    """Batch block so each step moves ~MiB of v+out, fits VMEM, and keeps
    the grid length >= 2 when possible (v7x megacore)."""
    target_step_bytes = 2 * 1024 * 1024
    vmem_cap_bytes = 12 * 1024 * 1024      # double-buffered v+out budget
    per_batch = (K + Q) * TD * elem_bytes
    bb = max(1, min(B, target_step_bytes // max(per_batch, 1)))
    while bb > 1 and 2 * bb * per_batch > vmem_cap_bytes:
        bb -= 1
    if n_d == 1 and B >= 2:
        bb = min(bb, pl.cdiv(B, 2))        # keep >= 2 grid steps for 2 TCs
    # Prefer a BB that divides B (avoids padded partial batch blocks).
    for cand in range(int(bb), 0, -1):
        if B % cand == 0:
            return cand
    return 1


def mimo_general_dot_product_attention(qu, k, v, weight, bias):
    """qu: (B, Q, qs), k: (B, K, ks), v: (B, K, C, H, W).
    weight: (ks, qs) PyTorch-style nn.Linear weight; bias: (ks,).
    Returns (output_sum (B, Q, C, H, W), attn (B, K, Q))."""
    B, Q, QS = qu.shape
    _, K, KS = k.shape
    _, _, C, H, W = v.shape
    D = C * H * W

    # Big operands keep their native dtype (pass bf16 upstream for ~2x on the
    # mem-bound roofline).  Only the tiny projection params are forced to f32.
    v_flat = v.reshape(B, K, D)
    wt = weight.T.astype(jnp.float32)              # (QS, KS)
    b2 = bias.reshape(1, KS).astype(jnp.float32)   # (1, KS)

    TD = _pick_td(D)
    n_d = pl.cdiv(D, TD)
    BB = _pick_bb(B, Q, K, TD, n_d, v_flat.dtype.itemsize)
    n_b = pl.cdiv(B, BB)

    out_dtype = v.dtype

    out_flat, attn = pl.pallas_call(
        _mimo_attn_kernel,
        out_shape=(
            jax.ShapeDtypeStruct((B, Q, D), out_dtype),
            jax.ShapeDtypeStruct((B, K, Q), jnp.float32),
        ),
        grid_spec=pltpu.PrefetchScalarGridSpec(
            num_scalar_prefetch=0,
            grid=(n_b, n_d),
            in_specs=[
                pl.BlockSpec((BB, Q, QS), lambda b, d: (b, 0, 0)),   # qu
                pl.BlockSpec((QS, KS),    lambda b, d: (0, 0)),      # W^T
                pl.BlockSpec((1, KS),     lambda b, d: (0, 0)),      # bias
                pl.BlockSpec((BB, K, KS), lambda b, d: (b, 0, 0)),   # k
                pl.BlockSpec((BB, K, TD), lambda b, d: (b, 0, d)),   # v
            ],
            out_specs=[
                pl.BlockSpec((BB, Q, TD), lambda b, d: (b, 0, d)),   # out
                pl.BlockSpec((BB, K, Q),  lambda b, d: (b, 0, 0)),   # attn
            ],
            scratch_shapes=[pltpu.VMEM((BB, K, Q), jnp.float32)],    # p cache
        ),
        compiler_params=pltpu.CompilerParams(
            dimension_semantics=("parallel", "arbitrary"),
            vmem_limit_bytes=32 * 1024 * 1024,
        ),
    )(qu, wt, b2, k, v_flat)

    return out_flat.reshape(B, Q, C, H, W), attn


def _reference(qu, k, v, weight, bias):
    """Pure-JAX reference mirroring the PyTorch forward."""
    query = jnp.einsum("bqi,oi->bqo", qu, weight) + bias          # (B, Q, ks)
    attn = jnp.einsum("bki,bqi->bkq", k, query)                   # (B, K, Q)
    attn = jax.nn.softmax(attn, axis=1)                           # softmax over K
    out = jnp.einsum("bkq,bkchw->bqchw", attn, v)                 # (B, Q, C, H, W)
    return out, attn


if __name__ == "__main__":
    # Small shapes consistent with the module's forward.
    B, K, Q = 2, 4, 4
    QUERY_SIZE, KEY_SIZE = 32, 32
    C, H, W = 4, 16, 16

    key = jax.random.PRNGKey(0)
    k_qu, k_k, k_v, k_w, k_b = jax.random.split(key, 5)

    qu = jax.random.normal(k_qu, (B, Q, QUERY_SIZE), dtype=jnp.float32)
    kk = jax.random.normal(k_k, (B, K, KEY_SIZE), dtype=jnp.float32)
    vv = jax.random.normal(k_v, (B, K, C, H, W), dtype=jnp.float32)

    # Deterministic nn.Linear(query_size, key_size) parameters.
    weight = jax.random.normal(k_w, (KEY_SIZE, QUERY_SIZE), dtype=jnp.float32) * 0.1
    bias = jax.random.normal(k_b, (KEY_SIZE,), dtype=jnp.float32) * 0.1

    out, attn = mimo_general_dot_product_attention(qu, kk, vv, weight, bias)
    out, attn = jax.block_until_ready((out, attn))

    ref_out, ref_attn = _reference(qu, kk, vv, weight, bias)
    assert out.shape == (B, Q, C, H, W) and attn.shape == (B, K, Q)
    assert jnp.allclose(out, ref_out, atol=1e-4, rtol=1e-4)
    assert jnp.allclose(attn, ref_attn, atol=1e-5, rtol=1e-5)

    print("KERNEL_OK")
</pallas_src>

<mosaic_0001>
module attributes {stable_mosaic.version = 11 : i64} {
  func.func @_mimo_attn_kernel(%arg0: i32, %arg1: i32, %arg2: memref<1x4x32xf32, #tpu.memory_space<vmem>>, %arg3: memref<32x32xf32, #tpu.memory_space<vmem>>, %arg4: memref<1x32xf32, #tpu.memory_space<vmem>>, %arg5: memref<1x4x32xf32, #tpu.memory_space<vmem>>, %arg6: memref<1x4x1024xf32, #tpu.memory_space<vmem>>, %arg7: memref<1x4x1024xf32, #tpu.memory_space<vmem>>, %arg8: memref<1x4x4xf32, #tpu.memory_space<vmem>>, %arg9: memref<1x4x4xf32, #tpu.memory_space<vmem>>) attributes {dimension_semantics = [#tpu.dimension_semantics<parallel>, #tpu.dimension_semantics<arbitrary>], iteration_bounds = array<i64: 2, 1>, scalar_prefetch = 0 : i64, scratch_operands = 1 : i64, tpu.core_type = #tpu.core_type<tc>, window_params = [{transform_indices = @transform_0, window_bounds = array<i64: 1, 4, 32>}, {pipeline_mode = #tpu.pipeline_mode<synchronous>, transform_indices = @transform_1, window_bounds = array<i64: 32, 32>}, {pipeline_mode = #tpu.pipeline_mode<synchronous>, transform_indices = @transform_2, window_bounds = array<i64: 1, 32>}, {transform_indices = @transform_3, window_bounds = array<i64: 1, 4, 32>}, {transform_indices = @transform_4, window_bounds = array<i64: 1, 4, 1024>}, {transform_indices = @transform_5, window_bounds = array<i64: 1, 4, 1024>}, {transform_indices = @transform_6, window_bounds = array<i64: 1, 4, 4>}]} {
    %c0_i32 = arith.constant 0 : i32
    %0 = arith.cmpi eq, %arg1, %c0_i32 : i32
    %1 = arith.extui %0 : i1 to i32
    %c0_i32_0 = arith.constant 0 : i32
    %2 = arith.cmpi ne, %1, %c0_i32_0 : i32
    scf.if %2 {
      %c0_9 = arith.constant 0 : index
      %c0_10 = arith.constant 0 : index
      %c0_11 = arith.constant 0 : index
      %7 = vector.load %arg2[%c0_9, %c0_10, %c0_11] : memref<1x4x32xf32, #tpu.memory_space<vmem>>, vector<1x4x32xf32>
      %c0_12 = arith.constant 0 : index
      %c0_13 = arith.constant 0 : index
      %8 = vector.load %arg3[%c0_12, %c0_13] : memref<32x32xf32, #tpu.memory_space<vmem>>, vector<32x32xf32>
      %c0_14 = arith.constant 0 : index
      %c0_15 = arith.constant 0 : index
      %9 = vector.load %arg4[%c0_14, %c0_15] : memref<1x32xf32, #tpu.memory_space<vmem>>, vector<1x32xf32>
      %cst_16 = arith.constant dense<0.000000e+00> : vector<1x4x32xf32>
      %10 = tpu.matmul %7, %8, %cst_16 {dimension_numbers = #tpu.dot_dimension_numbers<[2], [0], [0, 1], [1], [0, 0, 0, 1, 1, 1], [], []>} : vector<1x4x32xf32>, vector<32x32xf32>, vector<1x4x32xf32> -> vector<1x4x32xf32>
      %11 = vector.shape_cast %9 : vector<1x32xf32> to vector<1x1x32xf32>
      %12 = vector.broadcast %11 : vector<1x1x32xf32> to vector<1x4x32xf32>
      %13 = arith.addf %10, %12 : vector<1x4x32xf32>
      %c0_17 = arith.constant 0 : index
      %c0_18 = arith.constant 0 : index
      %c0_19 = arith.constant 0 : index
      %14 = vector.load %arg5[%c0_17, %c0_18, %c0_19] : memref<1x4x32xf32, #tpu.memory_space<vmem>>, vector<1x4x32xf32>
      %cst_20 = arith.constant dense<0.000000e+00> : vector<1x4x4xf32>
      %15 = tpu.matmul %14, %13, %cst_20 {dimension_numbers = #tpu.dot_dimension_numbers<[2], [2], [1], [1], [0, 0, 0, 1, 1, 1], [0], [0]>} : vector<1x4x32xf32>, vector<1x4x32xf32>, vector<1x4x4xf32> -> vector<1x4x4xf32>
      %cst_21 = arith.constant dense<0xFF800000> : vector<1x4xf32>
      %16 = vector.multi_reduction <maximumf>, %15, %cst_21 [1] : vector<1x4x4xf32> to vector<1x4xf32>
      %17 = vector.shape_cast %16 : vector<1x4xf32> to vector<1x1x4xf32>
      %18 = vector.broadcast %17 : vector<1x1x4xf32> to vector<1x4x4xf32>
      %19 = arith.subf %15, %18 : vector<1x4x4xf32>
      %20 = math.exp %19 : vector<1x4x4xf32>
      %cst_22 = arith.constant dense<0.000000e+00> : vector<1x4xf32>
      %21 = vector.multi_reduction <add>, %20, %cst_22 [1] : vector<1x4x4xf32> to vector<1x4xf32>
      %22 = vector.shape_cast %21 : vector<1x4xf32> to vector<1x1x4xf32>
      %23 = vector.broadcast %22 : vector<1x1x4xf32> to vector<1x4x4xf32>
      %24 = arith.divf %20, %23 : vector<1x4x4xf32>
      %c0_23 = arith.constant 0 : index
      %c0_24 = arith.constant 0 : index
      %c0_25 = arith.constant 0 : index
      %25 = vector.load %arg9[%c0_23, %c0_24, %c0_25] : memref<1x4x4xf32, #tpu.memory_space<vmem>>, vector<1x4x4xf32>
      tpu.vector_store %arg9[%c0_23, %c0_24, %c0_25], %24 {strides = array<i32>} : memref<1x4x4xf32, #tpu.memory_space<vmem>>, vector<1x4x4xf32>,
      %c0_26 = arith.constant 0 : index
      %c0_27 = arith.constant 0 : index
      %c0_28 = arith.constant 0 : index
      %26 = vector.load %arg8[%c0_26, %c0_27, %c0_28] : memref<1x4x4xf32, #tpu.memory_space<vmem>>, vector<1x4x4xf32>
      tpu.vector_store %arg8[%c0_26, %c0_27, %c0_28], %24 {strides = array<i32>} : memref<1x4x4xf32, #tpu.memory_space<vmem>>, vector<1x4x4xf32>,
    } else {
    }
    %c0 = arith.constant 0 : index
    %c0_1 = arith.constant 0 : index
    %c0_2 = arith.constant 0 : index
    %3 = vector.load %arg6[%c0, %c0_1, %c0_2] : memref<1x4x1024xf32, #tpu.memory_space<vmem>>, vector<1x4x1024xf32>
    %c0_3 = arith.constant 0 : index
    %c0_4 = arith.constant 0 : index
    %c0_5 = arith.constant 0 : index
    %4 = vector.load %arg9[%c0_3, %c0_4, %c0_5] : memref<1x4x4xf32, #tpu.memory_space<vmem>>, vector<1x4x4xf32>
    %cst = arith.constant dense<0.000000e+00> : vector<1x4x1024xf32>
    %5 = tpu.matmul %4, %3, %cst {dimension_numbers = #tpu.dot_dimension_numbers<[1], [1], [2], [2], [0, 0, 0, 2, 1, 2], [0], [0]>} : vector<1x4x4xf32>, vector<1x4x1024xf32>, vector<1x4x1024xf32> -> vector<1x4x1024xf32>
    %c0_6 = arith.constant 0 : index
    %c0_7 = arith.constant 0 : index
    %c0_8 = arith.constant 0 : index
    %6 = vector.load %arg7[%c0_6, %c0_7, %c0_8] : memref<1x4x1024xf32, #tpu.memory_space<vmem>>, vector<1x4x1024xf32>
    tpu.vector_store %arg7[%c0_6, %c0_7, %c0_8], %5 {strides = array<i32>} : memref<1x4x1024xf32, #tpu.memory_space<vmem>>, vector<1x4x1024xf32>,
    return
  }
  func.func @transform_0(%arg0: i32, %arg1: i32) -> (i32, i32, i32) {
    %c0_i32 = arith.constant 0 : i32
    %c0_i32_0 = arith.constant 0 : i32
    %c0_i32_1 = arith.constant 0 : i32
    return %arg0, %c0_i32, %c0_i32_0 : i32, i32, i32
  }
  func.func @transform_1(%arg0: i32, %arg1: i32) -> (i32, i32) {
    %c0_i32 = arith.constant 0 : i32
    %c0_i32_0 = arith.constant 0 : i32
    %c0_i32_1 = arith.constant 0 : i32
    return %c0_i32, %c0_i32_0 : i32, i32
  }
  func.func @transform_2(%arg0: i32, %arg1: i32) -> (i32, i32) {
    %c0_i32 = arith.constant 0 : i32
    %c0_i32_0 = arith.constant 0 : i32
    %c0_i32_1 = arith.constant 0 : i32
    return %c0_i32, %c0_i32_0 : i32, i32
  }
  func.func @transform_3(%arg0: i32, %arg1: i32) -> (i32, i32, i32) {
    %c0_i32 = arith.constant 0 : i32
    %c0_i32_0 = arith.constant 0 : i32
    %c0_i32_1 = arith.constant 0 : i32
    return %arg0, %c0_i32, %c0_i32_0 : i32, i32, i32
  }
  func.func @transform_4(%arg0: i32, %arg1: i32) -> (i32, i32, i32) {
    %c0_i32 = arith.constant 0 : i32
    %c0_i32_0 = arith.constant 0 : i32
    return %arg0, %c0_i32, %arg1 : i32, i32, i32
  }
  func.func @transform_5(%arg0: i32, %arg1: i32) -> (i32, i32, i32) {
    %c0_i32 = arith.constant 0 : i32
    %c0_i32_0 = arith.constant 0 : i32
    return %arg0, %c0_i32, %arg1 : i32, i32, i32
  }
  func.func @transform_6(%arg0: i32, %arg1: i32) -> (i32, i32, i32) {
    %c0_i32 = arith.constant 0 : i32
    %c0_i32_0 = arith.constant 0 : i32
    %c0_i32_1 = arith.constant 0 : i32
    return %arg0, %c0_i32, %c0_i32_0 : i32, i32, i32
  }
}

</mosaic_0001>

<bundles_post_ra>
// kernel: tpu_custom_call.1
= control target key start
LH: loop header
LB: loop body
LE: loop exit
PB: predicated region body
PF: predicated region fallthrough
CT: control target
= control target key end

     0   :  { %s1841_s0 = inlined_call_operand.hbm [shape: f32[2,4,32], index: 0, kind: input, shape index: {}]   ;;  %s1842_s1 = inlined_call_operand.hbm [shape: f32[32,32], index: 1, kind: input, shape index: {}]   ;;  %s1843_s2 = inlined_call_operand.vmem [shape: f32[1,32], index: 2, kind: input, shape index: {}]   ;;  %s1844_s3 = inlined_call_operand.hbm [shape: f32[2,4,32], index: 3, kind: input, shape index: {}]   ;;  %s1845_s4 = inlined_call_operand.hbm [shape: f32[2,4,1024], index: 4, kind: input, shape index: {}]   ;;  %s1846_s5 = inlined_call_operand.hbm [shape: f32[2,4,1024], index: 5, kind: output, shape index: {0}]   ;;  %s1847_s6 = inlined_call_operand.hbm [shape: f32[2,4,4], index: 6, kind: output, shape index: {1}]  }
   0x1   :  { %1851 = sst [smem:[#allocation18_spill]] %s1841_s0 }
   0x2   :  { %1852 = sst [smem:[#allocation19_spill]] %s1844_s3 }
   0x3   :  { %1853 = sst [smem:[#allocation20_spill]] %s1845_s4 }
   0x4   :  { %12 = vsyncpa [#allocation4], 0 }
   0x5   :  { %14 = vsyncpa [#allocation4 + $0x1], 0 }
   0x6   :  { %15 = vsyncpa [#allocation7], 0 }
   0x7   :  { %16 = vsyncpa [#allocation5], 0 }
   0x8   :  { %18 = vsyncpa [#allocation5 + $0x1], 0 }
   0x9   :  { %19 = vsyncpa [#allocation12], 0 }
   0xa   :  { %21 = vsyncpa [#allocation12 + $0x1], 0  ;;  %s1584_s21 = smov 0   ;;  %s1586_s22 = smov 0  }
   0xb   :  { %s1588_s23 = smov 0   ;;  %s1590_s24 = smov 0  }
   0xc   :  { %s1592_s25 = smov 0   ;;  %s1594_s26 = smov 0  }
   0xd LB: > { %s39_s27 = sadd.s32 1, %s1533_s25  ;;  %s46_s28 = sadd.s32 1, %s1525_s23  ;;  %s1537_s26 = sphi %s1594_s26, %s27_s26   ;;  %s1533_s25 = sphi %s1592_s25, %s1873_s25   ;;  %s1529_s24 = sphi %s1590_s24, %s1872_s24   ;;  %s1525_s23 = sphi %s1588_s23, %s1871_s23   ;;  %s1521_s22 = sphi %s1586_s22, %s1870_s22   ;;  %s1517_s21 = sphi %s1584_s21, %s1869_s21  }
   0xe   : > { %p41_p0 = scmp.ge.s32.totalorder %s39_s27, 2  ;;  %p53_p1 = scmp.ne.s32.totalorder %s1525_s23, %s1521_s22 }
   0xf   : > { %p54_p2 = scmp.eq.s32.totalorder %s1537_s26, 0  ;;  %p1245_p5 = scmp.lt.s32.totalorder %s1537_s26, 2 }
  0x10   : > { %s1875_s27 = smov (%p41_p0, %s39_s27), 0  ;;  %s249_s30 = sand.u32 1, %s1537_s26  }
  0x11   : > { %p55_p4 = por %p54_p2, %p53_p1  ;;  %s43_s29 = ssub.s32 %s1533_s25, %s1875_s27 }
  0x12   : > { %p44_p6 = scmp.eq.s32.totalorder %s43_s29, 0  ;;  %s251_s7 = sand.u32 1, %s1525_s23  }
  0x13   : > { %s1148_s8 = sshll.u32 %s1533_s25, 6  ;;  %s1147_s10 = sshll.u32 %s251_s7, 2 }
  0x14   : > { %s1632_s9 = scalar_select %p44_p6, %s1525_s23, %s46_s28  }
  0x15   : > { %s1854_s0 = sld [smem:[#allocation18_spill]]  ;;  %p1639_p7 = pnand %p1245_p5, %p55_p4 }
  0x16   : > { %s253_s15 = scalar_lea.vmem [#allocation3], %s1147_s10  ;;  %s1643_s17 = scalar_lea.sflag [#allocation4], %s249_s30 }
  0x17   : > { %s260_s16 = sshll.u32 %s253_s15, 4  ;;  %p1849_p8 = pneg %p1639_p7  ;;  %s261_s16 = int_to_ptr.vmem [resolvable:$true] %s260_s16 }
  0x18   : > { %s1322_s18 = scalar_lea.vmem %s261_s16, 64  ;;  %s1539_s19 = smov [#allocation3]  }
  0x19   : > { %p1323_p9 = scmp.ne.s32.totalorder %s261_s16, %s1322_s18  ;;  %s1327_s20 = sshll.u32 %s1539_s19, 4  ;;  %s1328_s20 = int_to_ptr.vmem [resolvable:$false] %s1327_s20 }
  0x1a   : > { %s1329_s28 = scalar_lea.vmem %s1328_s20, 128  ;;  %p1330_p12 = scmp.lt.s32.totalorder %s261_s16, %s1328_s20 }
  0x1b   : > { %s258_s13 = scalar_lea.hbm %s1854_s0, %s1148_s8  ;;  %p1325_p10 = pnand %p1323_p9, %p1849_p8 }
  0x1c   : > { %p1331_p13 = scmp.lt.s32.totalorder %s1329_s28, %s1322_s18 }
  0x1d   : > { %p1326_p11 = pneg %p1325_p10 }
  0x1e   : > { %p1332_p0 = por %p1331_p13, %p1330_p12 }
  0x20   : > { %p1333_p2 = pnand %p1332_p0, %p1326_p11 }
  0x22   : > { %1336 = shalt.err (!%p1333_p2)
}
  0x23   : > { %1230 = dma.hbm_to_vmem [thread:$0]  (!%p1639_p7), %s258_s13, 64, %s261_s16, %s1643_s17  }
  0x24   : > { %s1856_s3 = sld [smem:[#allocation19_spill]]  ;;  %s271_s12 = scalar_lea.vmem [#allocation8], %s1147_s10 }
  0x25   : > { %s278_s15 = sshll.u32 %s271_s12, 4  ;;  %s1540_s18 = smov [#allocation8]   ;;  %s279_s15 = int_to_ptr.vmem [resolvable:$true] %s278_s15 }
  0x26   : > { %s1350_s19 = scalar_lea.vmem %s279_s15, 64  ;;  %s1355_s20 = sshll.u32 %s1540_s18, 4  ;;  %s1356_s20 = int_to_ptr.vmem [resolvable:$false] %s1355_s20 }
  0x27   : > { %p1351_p4 = scmp.ne.s32.totalorder %s279_s15, %s1350_s19  ;;  %s1357_s28 = scalar_lea.vmem %s1356_s20, 128 }
  0x28   : > { %p1358_p9 = scmp.lt.s32.totalorder %s279_s15, %s1356_s20  ;;  %p1359_p10 = scmp.lt.s32.totalorder %s1357_s28, %s1350_s19 }
  0x29   : > { %p1353_p5 = pnand %p1351_p4, %p1849_p8 }
  0x2a   : > { %s276_s11 = scalar_lea.hbm %s1856_s3, %s1148_s8  ;;  %p1360_p11 = por %p1359_p10, %p1358_p9 }
  0x2b   : > { %p1354_p6 = pneg %p1353_p5 }
  0x2d   : > { %p1361_p12 = pnand %p1360_p11, %p1354_p6 }
  0x2f   : > { %1364 = shalt.err (!%p1361_p12)
}
  0x30   : > { %1233 = dma.hbm_to_vmem [thread:$0]  (!%p1639_p7), %s276_s11, 64, %s279_s15, %s1643_s17  }
  0x31   : > { %s1663_s8 = sadd.s32 4294967295, %s1537_s26   ;;  %s1143_s10 = sadd.s32 4294967294, %s1537_s26  }
  0x32   : > { %p59_p13 = scmp.ne.s32.totalorder %s1521_s22, %s1517_s21  ;;  %p1848_p0 = scmp.eq.s32.totalorder %s1663_s8, 0 }
  0x33   : > { %p181_p2 = scmp.eq.s32.totalorder %s1663_s8, 1  ;;  %p187_p4 = scmp.eq.s32.totalorder %s1143_s10, 1 }
  0x34   : > { %p1144_p5 = scmp.ge.s32.totalorder %s1537_s26, 1  ;;  %p1673_p6 = por %p1848_p0, %p59_p13 }
  0x35   : > { %p1680_p9 = por %p181_p2, %p53_p1  ;;  %p1684_p10 = por %p187_p4, %p59_p13 }
  0x36   : > { %p220_p11 = scmp.lt.s32.totalorder %s1537_s26, 3  ;;  %s1541_s11 = smov [#allocation6]  }
  0x37   : > { %s1858_s16 = scalar_select %p1680_p9, 1, 0 }
  0x38   : > { %s1859_s29 = scalar_select %p1684_p10, 1, 0 }
  0x39   : > { %p1689_p12 = pnand %p1144_p5, %p220_p11  ;;  %s232_s12 = sshll.u32 %s1541_s11, 4  ;;  %s233_s12 = int_to_ptr.vmem [resolvable:$true] %s232_s12 }
  0x3a   : > { %s1151_s15 = sshll.u32 %s251_s7, 5  ;;  %s1184_s19 = sshll.u32 %s1533_s25, 9 }
  0x3b   : > { %p1223_p3 = pneg %p1689_p12  ;;  %s1862_s4 = sld [smem:[#allocation20_spill]] }
  0x3c   : > { %s289_s0 = scalar_lea.vmem [#allocation9], %s1151_s15  ;;  %s1376_s11 = scalar_lea.vmem %s233_s12, 512 }
  0x3d   : > { %p1700_p1 = pnand %p1223_p3, %p1848_p0  ;;  %s299_s3 = sshll.u32 %s289_s0, 4  ;;  %s300_s3 = int_to_ptr.vmem [resolvable:$true] %s299_s3 }
  0x3e   : > { %p1377_p2 = scmp.ne.s32.totalorder %s233_s12, %s1376_s11  ;;  %p1384_p11 = scmp.lt.s32.totalorder %s233_s12, %s233_s12 }
  0x3f   : > { %p1367_p13 = pneg %p1700_p1  ;;  %p1385_p3 = scmp.lt.s32.totalorder %s1376_s11, %s1376_s11 }
  0x41   : > { %s1707_s10 = scalar_lea.hbm %s1862_s4, %s1184_s19  ;;  %p1379_p4 = pnand %p1377_p2, %p1367_p13 }
  0x42   : > { %p1386_p0 = por %p1385_p3, %p1384_p11 }
  0x43   : > { %p1380_p5 = pneg %p1379_p4 }
  0x45   : > { %p1387_p8 = pnand %p1386_p0, %p1380_p5 }
  0x47   : > { %1390 = shalt.err (!%p1387_p8)
}
  0x48   : > { %s1542_s7 = smov 128   ;;  %s1543_s20 = smov 8  }
  0x49   : > { %1226 = dma.hbm_to_vmem [thread:$0]  (!%p1700_p1), %s1842_s1, 512, %s233_s12, [#allocation7], %s1542_s7, %s1542_s7, %s1543_s20  }
  0x4a   : > { %s1404_s0 = scalar_lea.vmem %s300_s3, 512  ;;  %p1863_p9 = pneg %p1639_p7 }
  0x4b   : > { %p1405_p10 = scmp.ne.s32.totalorder %s300_s3, %s1404_s0  ;;  %s1544_s28 = smov [#allocation9]  }
  0x4c   : > { %s1409_s11 = sshll.u32 %s1544_s28, 4  ;;  %s1410_s11 = int_to_ptr.vmem [resolvable:$false] %s1409_s11 }
  0x4d   : > { %p1407_p13 = pnand %p1405_p10, %p1863_p9  ;;  %s1411_s4 = scalar_lea.vmem %s1410_s11, 1024 }
  0x4e   : > { %p1412_p8 = scmp.lt.s32.totalorder %s300_s3, %s1410_s11  ;;  %p1413_p0 = scmp.lt.s32.totalorder %s1411_s4, %s1404_s0 }
  0x4f   : > { %p1408_p2 = pneg %p1407_p13 }
  0x50   : > { %p1414_p4 = por %p1413_p0, %p1412_p8 }
  0x52   : > { %p1415_p5 = pnand %p1414_p4, %p1408_p2 }
  0x54   : > { %1418 = shalt.err (!%p1415_p5)
}
  0x55   : > { %1236 = dma.hbm_to_vmem [thread:$0]  (!%p1639_p7), %s1707_s10, 512, %s300_s3, %s1643_s17  }
  0x56   : > { %308 = sbr.rel (%p1689_p12) target bundleno = 906 (0x38a), region = 40  ;;  %s310_s12 = sand.u32 (!%p1689_p12), 1, %s1663_s8  }
  0x57   : > { %s1727_s18 = sand.u32 (!%p1689_p12), 1, %s1521_s22   ;;  %s311_s4 = scalar_lea.sflag (!%p1689_p12), [#allocation4], %s310_s12 }
  0x58   : > { %s1730_s7 = sshll.u32 (!%p1689_p12), %s1727_s18, 2 }
  0x59   : > { %s314_s20 = scalar_lea.vmem (!%p1689_p12), [#allocation3], %s1730_s7 }
  0x5b   : > { %1496 = dma.done.wait (%p1673_p6), %s311_s4, 64  }
  0x5c   : > { %1498 = vsyncadd (%p1673_p6), %s311_s4, 4294967232  ;;  %p1864_p7 = scmp.eq.s32.totalorder %s1663_s8, 0 }
  0x5e   : > { %1500 = dma.done.wait (%p1864_p7), [#allocation7], 512   ;;  %p1865_p9 = pmov %p1864_p7 }
  0x5f   : > { %s327_s3 = scalar_lea.vmem [#allocation8], %s1730_s7 }
  0x60   : > { %1502 = vsyncadd (%p1865_p9), [#allocation7], 4294966784 }
  0x61   : > { %1504 = dma.done.wait (%p1673_p6), %s311_s4, 576  }
  0x62   : > { %1506 = vsyncadd (%p1673_p6), %s311_s4, 4294966720  ;;  %v1545_v0 = vmov 0.0   ;;  %vm1546_vm0 = vmmov 0   ;;  %v390_v1 = vld [vmem:[#allocation6 + $0x18] sm:$0xff]  ;;  %v389_v2 = vld [vmem:[#allocation6 + $0x10] sm:$0xff]  ;;  %vm398_vm1 = vcmask 261120  }
  0x63   : > { %1193 = vmatprep.subr.mxu0 %v1545_v0  ;;  %1201 = vmatprep.mubr.msk.f32.mxu0 %vm1546_vm0, %v1545_v0  ;;  %v388_v3 = vld [vmem:[#allocation6 + $0x8] sm:$0xff]  ;;  %v387_v4 = vld [vmem:[#allocation6] sm:$0xff]  ;;  %v386_v5 = vld [vmem:[%s314_s20] sm:$0xf]  ;;  %s1158_s8 = sshll.u32 %s1727_s18, 5  ;;  %vm620_vm2 = vcmask 1043456  }
  0x64   : > { %1204 = vmatprep.subr.mxu1 %v1545_v0  ;;  %1206 = vmatprep.mubr.msk.f32.mxu1 %vm1546_vm0, %v1545_v0  ;;  %v1161_v6 = vld [vmem:[%s1843_s2] ss:$0 sm:$0xff]  ;;  %v472_v10 = vld [vmem:[%s327_s3] sm:$0xf]  ;;  %s336_s13 = scalar_lea.vmem [#allocation9], %s1158_s8  ;;  %vm549_vm3 = vcmask 27648  }
  0x65   : > { %1194 = vmatpush3.msra.mxu0 %v390_v1  ;;  %v571_v11 = vld [vmem:[%s336_s13] sm:$0xff]  ;;  %v572_v12 = vld [vmem:[%s336_s13 + $0x8] sm:$0xff]  ;;  %v573_v13 = vld [vmem:[%s336_s13 + $0x10] sm:$0xff]  ;;  %s379_s30 = scalar_lea.vmem [#allocation11], %s1730_s7  ;;  %vm616_vm4 = vcmask 31744   ;;  %s1181_s10 = sshll.u32 %s1529_s24, 6 }
  0x66   : > { %1195 = vmatprep.subr.mxu0 %v1545_v0  ;;  %v612_v14 = vcombine.high %v571_v11, %v571_v11  ;;  %v613_v15 = vcombine.high %v572_v12, %v572_v12  ;;  %v614_v16 = vcombine.high %v573_v13, %v573_v13  ;;  %v574_v17 = vld [vmem:[%s336_s13 + $0x18] sm:$0xff]  ;;  %s976_s19 = sshll.u32 %s379_s30, 4  ;;  %s974_s28 = scalar_lea.hbm %s1847_s6, %s1181_s10  ;;  %s977_s19 = int_to_ptr.vmem [resolvable:$true] %s976_s19 }
  0x67   : > { %1196 = vmatpush3.msra.mxu0 %v389_v2  ;;  %v615_v18 = vcombine.high %v574_v17, %v574_v17  ;;  %s947_s11 = scalar_lea.sflag [#allocation12], %s1727_s18  ;;  %s1419_s12 = scalar_lea.vmem %s977_s19, 64 }
  0x68   : > { %1197 = vmatprep.subr.mxu0 %v1545_v0  ;;  %p1420_p6 = scmp.ne.s32.totalorder %s977_s19, %s1419_s12  ;;  %p1866_p10 = scmp.ne.s32.totalorder %s1858_s16, 0 }
  0x69   : > { %1198 = vmatpush3.msra.mxu0 %v388_v3  ;;  %s1547_s7 = smov [#allocation11]  }
  0x6a   : > { %1199 = vmatprep.subr.mxu0 %v1545_v0  ;;  %p1421_p12 = pnand %p1420_p6, %p1866_p10  ;;  %s1423_s4 = sshll.u32 %s1547_s7, 4  ;;  %s1424_s4 = int_to_ptr.vmem [resolvable:$false] %s1423_s4 }
  0x6b   : > { %1200 = vmatpush3.msra.mxu0 %v387_v4  ;;  %s1425_s20 = scalar_lea.vmem %s1424_s4, 128  ;;  %p1426_p11 = scmp.lt.s32.totalorder %s977_s19, %s1424_s4 }
  0x6c   : > { %1202 = vmatmul.mubr.msk.f32.vlgmr.msra.gmra.mxu0 %vm398_vm1, %v386_v5  ;;  %1168 = vmatprep.subr.msk.mxu0 %vm620_vm2, %v613_v15  ;;  %p1422_p1 = pneg %p1421_p12  ;;  %p1427_p3 = scmp.lt.s32.totalorder %s1425_s20, %s1419_s12 }
  0x6d   : > { %772 = vmatprep.mubr.f32.mxu0 %v1545_v0  ;;  %1169 = vmatpush1.msk.msra.mxu0 %vm620_vm2, %v572_v12 }
  0x6e   : > { %1174 = vmatprep.subr.msk.mxu0 %vm620_vm2, %v615_v18  ;;  %p1428_p13 = por %p1427_p3, %p1426_p11 }
  0x70   : > { %p1429_p2 = pnand %p1428_p13, %p1422_p1 }
 0x12c   : > { %v468_v7 = vpop.f32.mrf.mxu0 }
 0x12d   : > { %v469_v8 = vadd.f32 %v1161_v6, %v468_v7 }
 0x12e   : > { %v1203_v9 = vpop.f32.mrf.mxu0 }
 0x12f   : > { %1205 = vmatpush3.xpose.msk.msra.mxu1 %vm398_vm1, %v469_v8 }
 0x130   : > { %1165 = vmatprep.subr.msk.mxu1 %vm620_vm2, %v612_v14 }
 0x132   : > { %1207 = vmatmul.mubr.msk.f32.vlgmr.msra.gmra.mxu1 %vm398_vm1, %v472_v10 }
 0x133   : > { %701 = vmatprep.mubr.f32.mxu1 %v1545_v0  ;;  %1166 = vmatpush1.msk.msra.mxu1 %vm620_vm2, %v571_v11 }
 0x134   : > { %1171 = vmatprep.subr.msk.mxu1 %vm620_vm2, %v614_v16 }
 0x1f2   : > { %v545_v19 = vpop.f32.mrf.mxu1 }
 0x1f3   : > { %v550_v20 = vsel %vm549_vm3, %v545_v19, -inf }
 0x1f4   : > { %v551_v21 = vrot.slane %v550_v20, 4  ;;  %v1208_v22 = vpop.f32.mrf.mxu1 }
 0x1f6   : > { %v552_v23 = vmax.f32 %v550_v20, %v551_v21 }
 0x1f8   : > { %v553_v24 = vrot.slane %v552_v23, 2 }
 0x1fa   : > { %v554_v25 = vmax.f32 %v552_v23, %v553_v24 }
 0x1fc   : > { %v555_v26 = vrot.slane %v554_v25, 1 }
 0x1fe   : > { %v556_v27 = vmax.f32 %v554_v25, %v555_v26 }
 0x200   : > { %v557_v28 = vsub.f32 %v545_v19, %v556_v27 }
 0x202   : > { %v558_v29 = vmul.f32 1.442695, %v557_v28 }
 0x204   : > { %1305 = vpow2.f32 %v558_v29 }
 0x211   : > { %v1306_v30 = vpop.eup %1305 }
 0x212   : > { %v560_v31 = vsel %vm549_vm3, %v1306_v30, 0.0 }
 0x213   : > { %v561_v32 = vrot.slane %v560_v31, 4 }
 0x215   : > { %v562_v33 = vadd.f32 %v561_v32, %v560_v31 }
 0x217   : > { %v563_v34 = vrot.slane %v562_v33, 2 }
 0x219   : > { %v564_v35 = vadd.f32 %v563_v34, %v562_v33 }
 0x21b   : > { %v565_v36 = vrot.slane %v564_v35, 1 }
 0x21d   : > { %v566_v37 = vadd.f32 %v565_v36, %v564_v35 }
 0x21f   : > { %1307 = vrcp.f32 %v566_v37 }
 0x22c   : > { %v1308_v38 = vpop.eup %1307 }
 0x22d   : > { %v568_v39 = vmul.f32 %v1308_v38, %v1306_v30 }
 0x22f   : > { %569 = vst.msk [vmem:[#allocation2] sm:$0xf] %vm549_vm3, %v568_v39  ;;  %570 = vst.msk [vmem:[%s379_s30] sm:$0xf] %vm549_vm3, %v568_v39 }
 0x236   : > { %v575_v40 = vld [vmem:[#allocation2] sm:$0xf] }
 0x237   : > { %576 = vxpose.xlu0.b32.start.end [1/1] (short) (narrow) %v575_v40, 8 }
 0x2b3   : > { %v592_v41 = vpop.trf.xlu0 }
 0x2b4   : > { %1167 = vmatmul.mubr.msk.f32.vlgmr.msra.gmra.mxu1 %vm616_vm4, %v592_v41  ;;  %1170 = vmatmul.mubr.msk.f32.vlgmr.msra.gmra.mxu0 %vm616_vm4, %v592_v41 }
 0x2b5   : > { %1172 = vmatpush1.msk.msra.mxu1 %vm620_vm2, %v573_v13  ;;  %1175 = vmatpush1.msk.msra.mxu0 %vm620_vm2, %v574_v17 }
 0x2b6   : > { %843 = vmatprep.mubr.f32.mxu1 %v1545_v0  ;;  %914 = vmatprep.mubr.f32.mxu0 %v1545_v0 }
 0x2b8   : > { %1173 = vmatmul.mubr.msk.f32.vlgmr.msra.gmra.mxu1 %vm616_vm4, %v592_v41  ;;  %1176 = vmatmul.mubr.msk.f32.vlgmr.msra.gmra.mxu0 %vm616_vm4, %v592_v41 }
 0x2b9   : > { %1432 = shalt.err (!%p1429_p2)
}
 0x2ba   : > { %s1433_s3 = scalar_lea.hbm %s974_s28, 64  ;;  %s1437_s13 = scalar_lea.hbm %s1847_s6, 128 }
 0x2bb   : > { %p1434_p8 = scmp.ne.s32.totalorder %s974_s28, %s1433_s3  ;;  %p1438_p5 = scmp.lt.s32.totalorder %s974_s28, %s1847_s6 }
 0x2bc   : > { %p1439_p7 = scmp.lt.s32.totalorder %s1437_s13, %s1433_s3 }
 0x2bd   : > { %p1435_p0 = pnand %p1434_p8, %p1866_p10 }
 0x2be   : > { %p1440_p9 = por %p1439_p7, %p1438_p5 }
 0x2bf   : > { %p1436_p4 = pneg %p1435_p0 }
 0x2c1   : > { %p1441_p6 = pnand %p1440_p9, %p1436_p4 }
 0x2c3   : > { %1444 = shalt.err (!%p1441_p6)
}
 0x2c4   : > { %1220 = dma.vmem_to_hbm [thread:$0]  (%p1866_p10), %s977_s19, 64, %s974_s28, %s947_s11  }
 0x2c5   : > { %s1185_s15 = sshll.u32 %s1529_s24, 9  ;;  %s372_s0 = scalar_lea.vmem [#allocation10], %s1158_s8 }
 0x2c6   : > { %s963_s12 = sshll.u32 %s372_s0, 4  ;;  %s1799_s11 = scalar_lea.hbm %s1846_s5, %s1185_s15  ;;  %s964_s12 = int_to_ptr.vmem [resolvable:$true] %s963_s12 }
 0x2c7   : > { %s942_s7 = scalar_lea.sflag [#allocation5], %s1727_s18  ;;  %s1445_s24 = scalar_lea.vmem %s964_s12, 512 }
 0x2c8   : > { %p1446_p12 = scmp.ne.s32.totalorder %s964_s12, %s1445_s24  ;;  %s1548_s8 = smov [#allocation10]  }
 0x2c9   : > { %s1449_s4 = sshll.u32 %s1548_s8, 4  ;;  %s1450_s4 = int_to_ptr.vmem [resolvable:$false] %s1449_s4 }
 0x2ca   : > { %p1447_p1 = pnand %p1446_p12, %p1866_p10  ;;  %s1451_s20 = scalar_lea.vmem %s1450_s4, 1024 }
 0x2cb   : > { %p1452_p3 = scmp.lt.s32.totalorder %s964_s12, %s1450_s4  ;;  %p1453_p13 = scmp.lt.s32.totalorder %s1451_s20, %s1445_s24 }
 0x2cc   : > { %p1448_p11 = pneg %p1447_p1 }
 0x2cd   : > { %p1454_p2 = por %p1453_p13, %p1452_p3 }
 0x2cf   : > { %p1455_p8 = pnand %p1454_p2, %p1448_p11 }
 0x374   : > { %v703_v42 = vpop.f32.mrf.mxu1  ;;  %v774_v43 = vpop.f32.mrf.mxu0 }
 0x376   : > { %v705_v44 = vpop.f32.mrf.mxu1  ;;  %v776_v45 = vpop.f32.mrf.mxu0 }
 0x377   : > { %v929_v46 = vcombine.low %v703_v42, %v705_v44  ;;  %v930_v47 = vcombine.low %v774_v43, %v776_v45 }
 0x378   : > { %v845_v48 = vpop.f32.mrf.mxu1  ;;  %v916_v49 = vpop.f32.mrf.mxu0 }
 0x379   : > { %937 = vst [vmem:[%s372_s0] sm:$0xff] %v929_v46  ;;  %938 = vst [vmem:[%s372_s0 + $0x8] sm:$0xff] %v930_v47 }
 0x37a   : > { %v847_v50 = vpop.f32.mrf.mxu1  ;;  %v918_v51 = vpop.f32.mrf.mxu0 }
 0x37b   : > { %v931_v52 = vcombine.low %v845_v48, %v847_v50  ;;  %v932_v53 = vcombine.low %v916_v49, %v918_v51 }
 0x37d   : > { %939 = vst [vmem:[%s372_s0 + $0x10] sm:$0xff] %v931_v52  ;;  %940 = vst [vmem:[%s372_s0 + $0x18] sm:$0xff] %v932_v53 }
 0x37e   : > { %1458 = shalt.err (!%p1455_p8)
}
 0x37f   : > { %s1459_s3 = scalar_lea.hbm %s1799_s11, 512  ;;  %s1463_s17 = scalar_lea.hbm %s1846_s5, 1024 }
 0x380   : > { %p1460_p0 = scmp.ne.s32.totalorder %s1799_s11, %s1459_s3  ;;  %p1464_p7 = scmp.lt.s32.totalorder %s1799_s11, %s1846_s5 }
 0x381   : > { %p1465_p9 = scmp.lt.s32.totalorder %s1463_s17, %s1459_s3 }
 0x382   : > { %p1461_p4 = pnand %p1460_p0, %p1866_p10 }
 0x383   : > { %p1466_p6 = por %p1465_p9, %p1464_p7 }
 0x384   : > { %p1462_p5 = pneg %p1461_p4 }
 0x386   : > { %p1467_p12 = pnand %p1466_p6, %p1462_p5 }
 0x388   : > { %1470 = shalt.err (!%p1467_p12)
}
 0x389   : > { %1219 = dma.vmem_to_hbm [thread:$0]  (%p1866_p10), %s964_s12, 512, %s1799_s11, %s942_s7  }
 0x38a PF: > { %s988_s10 = sand.u32 1, %s1517_s21   ;;  %p1867_p1 = scmp.ne.s32.totalorder %s1859_s29, 0 }
 0x38b   : > { %p1868_p11 = scmp.ge.s32.totalorder %s1537_s26, 2  ;;  %s989_s15 = scalar_lea.sflag [#allocation5], %s988_s10 }
 0x38d   : > { %p1238_p3 = pnand %p1868_p11, %p1867_p1 }
 0x38f   : > { %p1239_p13 = pneg %p1238_p3 }
 0x391   : > { %1508 = dma.done.wait (%p1239_p13), %s989_s15, 512  }
 0x392   : > { %1510 = vsyncadd (%p1239_p13), %s989_s15, 4294966784  ;;  %s998_s0 = scalar_lea.sflag [#allocation12], %s988_s10 }
 0x393   : > { %1512 = dma.done.wait (%p1239_p13), %s998_s0, 64  }
 0x394   : > { %1514 = vsyncadd (%p1239_p13), %s998_s0, 4294967232  ;;  %s27_s26 = sadd.s32 1, %s1537_s26   ;;  %s1869_s21 = smov %s1521_s22 }
 0x395   : > { %p24_p2 = scmp.ge.s32.totalorder %s27_s26, 4   ;;  %s1870_s22 = smov %s1525_s23 }
 0x396   : > { %s1871_s23 = smov %s1632_s9  ;;  %s1872_s24 = smov %s1533_s25 }
 0x397   : > { %s1873_s25 = smov %s1875_s27  ;;  %26 = sbr.rel (!%p24_p2) target bundleno = 13 (0xd), region = 132 }
 0x39c   :  { %1003 = vsyncpa [#allocation4], 1 }
 0x39d   :  { %1005 = vsyncpa [#allocation4 + $0x1], 1 }
 0x39e   :  { %1006 = vsyncpa [#allocation7], 1 }
 0x39f   :  { %1007 = vsyncpa [#allocation5], 1 }
 0x3a0   :  { %1009 = vsyncpa [#allocation5 + $0x1], 1 }
 0x3a1   :  { %1010 = vsyncpa [#allocation12], 1 }
 0x3a2   :  { %1012 = vsyncpa [#allocation12 + $0x1], 1 }

</bundles_post_ra>
